<compile_context>
chip_gen: v7x
topology: tpu7x:2x2x1
jax: 0.10.0
libtpu: 0.0.40
codegen_flags: <defaults>
</compile_context>

<pallas_src>
import jax
import jax.numpy as jnp
from jax.experimental import pallas as pl
from jax.experimental.pallas import tpu as pltpu

_LANE = 128


def _round_up(x, m):
    return (x + m - 1) // m * m


def _pick_spatial_tile(s):
    """Largest multiple-of-8 divisor of s (capped at 512); prefer >= 2 tiles."""
    cands = [t for t in range(8, min(s, 512) + 1, 8) if s % t == 0]
    if not cands:
        return s  # odd spatial sizes: single full block (legal: equals full dim)
    best = max(cands)
    proper = [t for t in cands if t < s]
    if best == s and proper and max(proper) >= 64:
        best = max(proper)  # ensure at least 2 spatial grid steps when cheap
    return best


def _matmul_bias_relu_kernel(p_ref, w_ref, shift_ref, o_ref):
    # p_ref:     (1, tS, Kc)  channel-folded im2col patches
    # w_ref:     (Kc, Cp)     BN-scale-folded weights (resident: constant index)
    # shift_ref: (1, Cp)      conv bias + BN shift, pre-folded
    # o_ref:     (1, tS, Cp)  lane-dense (Cp multiple of 128) output tile
    y = jnp.dot(p_ref[0], w_ref[...], preferred_element_type=jnp.float32)
    y = jnp.maximum(y + shift_ref[...], 0.0)          # fused bias/BN + ReLU
    o_ref[...] = y[None].astype(o_ref.dtype)


def conv3d_bn_relu(x_ndhwc, weight, bias, gamma, beta, run_mean, run_var,
                   eps=1e-5):
    """One Conv3d(k, stride=1, pad=k//2) + BatchNorm3d(eval) + ReLU.

    x_ndhwc: (N, D, H, W, Cin); weight: (Cout, Cin, K, K, K) (PyTorch layout).
    Returns (N, D, H, W, Cout).
    """
    N, D, H, W, Cin = x_ndhwc.shape
    Cout, _, K, _, _ = weight.shape
    pad = K // 2
    S = D * H * W
    k3c = K * K * K * Cin
    Kc = _round_up(k3c, _LANE)      # contraction dim, lane-aligned
    Cp = _round_up(Cout, _LANE)     # output channels, lane-dense stores
    tS = _pick_spatial_tile(S)

    # --- glue: channel-folded im2col (order matches weight reshape below) ---
    xp = jnp.pad(x_ndhwc, ((0, 0), (pad, pad), (pad, pad), (pad, pad), (0, 0)))
    cols = []
    for kd in range(K):
        for kh in range(K):
            for kw in range(K):
                cols.append(xp[:, kd:kd + D, kh:kh + H, kw:kw + W, :])
    patches = jnp.concatenate(cols, axis=-1).reshape(N, S, k3c)
    patches = jnp.pad(patches, ((0, 0), (0, 0), (0, Kc - k3c)))
    patches = patches.astype(jnp.float32)

    # --- fold BN scale into weights; bias + BN shift into a single add ---
    scale = gamma / jnp.sqrt(run_var + eps)                        # (Cout,)
    w = jnp.transpose(weight, (2, 3, 4, 1, 0)).reshape(k3c, Cout)  # (K^3*Cin, Cout)
    w = (w * scale[None, :]).astype(jnp.float32)
    shift = (bias * scale + beta - run_mean * scale).astype(jnp.float32)
    w = jnp.pad(w, ((0, Kc - k3c), (0, Cp - Cout)))
    shift = jnp.pad(shift, (0, Cp - Cout)).reshape(1, Cp)

    out = pl.pallas_call(
        _matmul_bias_relu_kernel,
        out_shape=jax.ShapeDtypeStruct((N, S, Cp), jnp.float32),
        grid_spec=pltpu.PrefetchScalarGridSpec(
            num_scalar_prefetch=0,
            grid=(N, S // tS),
            in_specs=[
                pl.BlockSpec((1, tS, Kc), lambda n, j: (n, j, 0)),
                pl.BlockSpec((Kc, Cp), lambda n, j: (0, 0)),
                pl.BlockSpec((1, Cp), lambda n, j: (0, 0)),
            ],
            out_specs=pl.BlockSpec((1, tS, Cp), lambda n, j: (n, j, 0)),
        ),
        compiler_params=pltpu.CompilerParams(
            dimension_semantics=("parallel", "parallel")),
    )(patches, w, shift)

    out = out[:, :, :Cout].reshape(N, D, H, W, Cout)
    return out.astype(x_ndhwc.dtype)


@jax.jit
def double_conv(x_ncdhw, params):
    """DoubleConv forward. x_ncdhw: (N, Cin, D, H, W) -> (N, Cout, D, H, W)."""
    x = jnp.transpose(x_ncdhw, (0, 2, 3, 4, 1))  # NCDHW -> NDHWC
    x = conv3d_bn_relu(x, params["w1"], params["b1"], params["g1"],
                       params["be1"], params["m1"], params["v1"])
    x = conv3d_bn_relu(x, params["w2"], params["b2"], params["g2"],
                       params["be2"], params["m2"], params["v2"])
    return jnp.transpose(x, (0, 4, 1, 2, 3))     # NDHWC -> NCDHW


# --------------------------- reference (pure JAX) ---------------------------
def _ref_conv_bn_relu(x_ncdhw, w, b, g, be, m, v, eps=1e-5):
    y = jax.lax.conv_general_dilated(
        x_ncdhw, w, window_strides=(1, 1, 1),
        padding=[(w.shape[2] // 2,) * 2] * 3,
        dimension_numbers=("NCDHW", "OIDHW", "NCDHW"),
        precision=jax.lax.Precision.HIGHEST)
    y = y + b[None, :, None, None, None]
    scale = g / jnp.sqrt(v + eps)
    shift = be - m * scale
    y = y * scale[None, :, None, None, None] + shift[None, :, None, None, None]
    return jnp.maximum(y, 0.0)


def _ref_double_conv(x, p):
    y = _ref_conv_bn_relu(x, p["w1"], p["b1"], p["g1"], p["be1"], p["m1"], p["v1"])
    return _ref_conv_bn_relu(y, p["w2"], p["b2"], p["g2"], p["be2"], p["m2"], p["v2"])


if __name__ == "__main__":
    N, Cin, Cout, D, H, W = 2, 4, 8, 8, 8, 8
    key = jax.random.PRNGKey(0)
    ks = jax.random.split(key, 13)

    x = jax.random.normal(ks[0], (N, Cin, D, H, W), jnp.float32)

    params = {
        # conv1 + bn1
        "w1": 0.1 * jax.random.normal(ks[1], (Cout, Cin, 3, 3, 3), jnp.float32),
        "b1": 0.1 * jax.random.normal(ks[2], (Cout,), jnp.float32),
        "g1": 1.0 + 0.1 * jax.random.normal(ks[3], (Cout,), jnp.float32),
        "be1": 0.1 * jax.random.normal(ks[4], (Cout,), jnp.float32),
        "m1": 0.1 * jax.random.normal(ks[5], (Cout,), jnp.float32),
        "v1": jax.random.uniform(ks[6], (Cout,), jnp.float32, 0.5, 1.5),
        # conv2 + bn2
        "w2": 0.1 * jax.random.normal(ks[7], (Cout, Cout, 3, 3, 3), jnp.float32),
        "b2": 0.1 * jax.random.normal(ks[8], (Cout,), jnp.float32),
        "g2": 1.0 + 0.1 * jax.random.normal(ks[9], (Cout,), jnp.float32),
        "be2": 0.1 * jax.random.normal(ks[10], (Cout,), jnp.float32),
        "m2": 0.1 * jax.random.normal(ks[11], (Cout,), jnp.float32),
        "v2": jax.random.uniform(ks[12], (Cout,), jnp.float32, 0.5, 1.5),
    }

    out = jax.block_until_ready(double_conv(x, params))
    assert out.shape == (N, Cout, D, H, W), out.shape

    ref = jax.block_until_ready(_ref_double_conv(x, params))
    assert jnp.all(jnp.isfinite(out))
    assert jnp.allclose(out, ref, rtol=2e-2, atol=2e-2), (
        float(jnp.max(jnp.abs(out - ref))))

    print("KERNEL_OK")
</pallas_src>

<mosaic_0001>
module attributes {stable_mosaic.version = 11 : i64} {
  func.func @_matmul_bias_relu_kernel(%arg0: i32, %arg1: i32, %arg2: memref<1x256x128xf32, #tpu.memory_space<vmem>>, %arg3: memref<128x128xf32, #tpu.memory_space<vmem>>, %arg4: memref<1x128xf32, #tpu.memory_space<vmem>>, %arg5: memref<1x256x128xf32, #tpu.memory_space<vmem>>) attributes {dimension_semantics = [#tpu.dimension_semantics<parallel>, #tpu.dimension_semantics<parallel>], iteration_bounds = array<i64: 2, 2>, scalar_prefetch = 0 : i64, scratch_operands = 0 : i64, tpu.core_type = #tpu.core_type<tc>, window_params = [{transform_indices = @transform_0, window_bounds = array<i64: 1, 256, 128>}, {pipeline_mode = #tpu.pipeline_mode<synchronous>, transform_indices = @transform_1, window_bounds = array<i64: 128, 128>}, {pipeline_mode = #tpu.pipeline_mode<synchronous>, transform_indices = @transform_2, window_bounds = array<i64: 1, 128>}, {transform_indices = @transform_3, window_bounds = array<i64: 1, 256, 128>}]} {
    %c0 = arith.constant 0 : index
    %c0_0 = arith.constant 0 : index
    %c0_1 = arith.constant 0 : index
    %0 = vector.load %arg2[%c0, %c0_0, %c0_1] : memref<1x256x128xf32, #tpu.memory_space<vmem>>, vector<1x256x128xf32>
    %1 = vector.shape_cast %0 : vector<1x256x128xf32> to vector<256x128xf32>
    %c0_2 = arith.constant 0 : index
    %c0_3 = arith.constant 0 : index
    %2 = vector.load %arg3[%c0_2, %c0_3] : memref<128x128xf32, #tpu.memory_space<vmem>>, vector<128x128xf32>
    %cst = arith.constant dense<0.000000e+00> : vector<256x128xf32>
    %3 = tpu.matmul %1, %2, %cst {dimension_numbers = #tpu.dot_dimension_numbers<[1], [0], [0], [1], [0, 0, 1, 1], [], []>} : vector<256x128xf32>, vector<128x128xf32>, vector<256x128xf32> -> vector<256x128xf32>
    %c0_4 = arith.constant 0 : index
    %c0_5 = arith.constant 0 : index
    %4 = vector.load %arg4[%c0_4, %c0_5] : memref<1x128xf32, #tpu.memory_space<vmem>>, vector<1x128xf32>
    %5 = vector.broadcast %4 : vector<1x128xf32> to vector<256x128xf32>
    %6 = arith.addf %3, %5 : vector<256x128xf32>
    %cst_6 = arith.constant 0.000000e+00 : f32
    %7 = vector.broadcast %cst_6 : f32 to vector<256x128xf32>
    %8 = arith.maximumf %6, %7 : vector<256x128xf32>
    %9 = vector.shape_cast %8 : vector<256x128xf32> to vector<1x256x128xf32>
    %c0_7 = arith.constant 0 : index
    %c0_8 = arith.constant 0 : index
    %c0_9 = arith.constant 0 : index
    %10 = vector.load %arg5[%c0_7, %c0_8, %c0_9] : memref<1x256x128xf32, #tpu.memory_space<vmem>>, vector<1x256x128xf32>
    tpu.vector_store %arg5[%c0_7, %c0_8, %c0_9], %9 {strides = array<i32>} : memref<1x256x128xf32, #tpu.memory_space<vmem>>, vector<1x256x128xf32>,
    return
  }
  func.func @transform_0(%arg0: i32, %arg1: i32) -> (i32, i32, i32) {
    %c0_i32 = arith.constant 0 : i32
    %c0_i32_0 = arith.constant 0 : i32
    return %arg0, %arg1, %c0_i32 : i32, i32, i32
  }
  func.func @transform_1(%arg0: i32, %arg1: i32) -> (i32, i32) {
    %c0_i32 = arith.constant 0 : i32
    %c0_i32_0 = arith.constant 0 : i32
    %c0_i32_1 = arith.constant 0 : i32
    return %c0_i32, %c0_i32_0 : i32, i32
  }
  func.func @transform_2(%arg0: i32, %arg1: i32) -> (i32, i32) {
    %c0_i32 = arith.constant 0 : i32
    %c0_i32_0 = arith.constant 0 : i32
    %c0_i32_1 = arith.constant 0 : i32
    return %c0_i32, %c0_i32_0 : i32, i32
  }
  func.func @transform_3(%arg0: i32, %arg1: i32) -> (i32, i32, i32) {
    %c0_i32 = arith.constant 0 : i32
    %c0_i32_0 = arith.constant 0 : i32
    return %arg0, %arg1, %c0_i32 : i32, i32, i32
  }
}

module attributes {stable_mosaic.version = 11 : i64} {
  func.func @_matmul_bias_relu_kernel(%arg0: i32, %arg1: i32, %arg2: memref<1x256x256xf32, #tpu.memory_space<vmem>>, %arg3: memref<256x128xf32, #tpu.memory_space<vmem>>, %arg4: memref<1x128xf32, #tpu.memory_space<vmem>>, %arg5: memref<1x256x128xf32, #tpu.memory_space<vmem>>) attributes {dimension_semantics = [#tpu.dimension_semantics<parallel>, #tpu.dimension_semantics<parallel>], iteration_bounds = array<i64: 2, 2>, scalar_prefetch = 0 : i64, scratch_operands = 0 : i64, tpu.core_type = #tpu.core_type<tc>, window_params = [{transform_indices = @transform_0, window_bounds = array<i64: 1, 256, 256>}, {pipeline_mode = #tpu.pipeline_mode<synchronous>, transform_indices = @transform_1, window_bounds = array<i64: 256, 128>}, {pipeline_mode = #tpu.pipeline_mode<synchronous>, transform_indices = @transform_2, window_bounds = array<i64: 1, 128>}, {transform_indices = @transform_3, window_bounds = array<i64: 1, 256, 128>}]} {
    %c0 = arith.constant 0 : index
    %c0_0 = arith.constant 0 : index
    %c0_1 = arith.constant 0 : index
    %0 = vector.load %arg2[%c0, %c0_0, %c0_1] : memref<1x256x256xf32, #tpu.memory_space<vmem>>, vector<1x256x256xf32>
    %1 = vector.shape_cast %0 : vector<1x256x256xf32> to vector<256x256xf32>
    %c0_2 = arith.constant 0 : index
    %c0_3 = arith.constant 0 : index
    %2 = vector.load %arg3[%c0_2, %c0_3] : memref<256x128xf32, #tpu.memory_space<vmem>>, vector<256x128xf32>
    %cst = arith.constant dense<0.000000e+00> : vector<256x128xf32>
    %3 = tpu.matmul %1, %2, %cst {dimension_numbers = #tpu.dot_dimension_numbers<[1], [0], [0], [1], [0, 0, 1, 1], [], []>} : vector<256x256xf32>, vector<256x128xf32>, vector<256x128xf32> -> vector<256x128xf32>
    %c0_4 = arith.constant 0 : index
    %c0_5 = arith.constant 0 : index
    %4 = vector.load %arg4[%c0_4, %c0_5] : memref<1x128xf32, #tpu.memory_space<vmem>>, vector<1x128xf32>
    %5 = vector.broadcast %4 : vector<1x128xf32> to vector<256x128xf32>
    %6 = arith.addf %3, %5 : vector<256x128xf32>
    %cst_6 = arith.constant 0.000000e+00 : f32
    %7 = vector.broadcast %cst_6 : f32 to vector<256x128xf32>
    %8 = arith.maximumf %6, %7 : vector<256x128xf32>
    %9 = vector.shape_cast %8 : vector<256x128xf32> to vector<1x256x128xf32>
    %c0_7 = arith.constant 0 : index
    %c0_8 = arith.constant 0 : index
    %c0_9 = arith.constant 0 : index
    %10 = vector.load %arg5[%c0_7, %c0_8, %c0_9] : memref<1x256x128xf32, #tpu.memory_space<vmem>>, vector<1x256x128xf32>
    tpu.vector_store %arg5[%c0_7, %c0_8, %c0_9], %9 {strides = array<i32>} : memref<1x256x128xf32, #tpu.memory_space<vmem>>, vector<1x256x128xf32>,
    return
  }
  func.func @transform_0(%arg0: i32, %arg1: i32) -> (i32, i32, i32) {
    %c0_i32 = arith.constant 0 : i32
    %c0_i32_0 = arith.constant 0 : i32
    return %arg0, %arg1, %c0_i32 : i32, i32, i32
  }
  func.func @transform_1(%arg0: i32, %arg1: i32) -> (i32, i32) {
    %c0_i32 = arith.constant 0 : i32
    %c0_i32_0 = arith.constant 0 : i32
    %c0_i32_1 = arith.constant 0 : i32
    return %c0_i32, %c0_i32_0 : i32, i32
  }
  func.func @transform_2(%arg0: i32, %arg1: i32) -> (i32, i32) {
    %c0_i32 = arith.constant 0 : i32
    %c0_i32_0 = arith.constant 0 : i32
    %c0_i32_1 = arith.constant 0 : i32
    return %c0_i32, %c0_i32_0 : i32, i32
  }
  func.func @transform_3(%arg0: i32, %arg1: i32) -> (i32, i32, i32) {
    %c0_i32 = arith.constant 0 : i32
    %c0_i32_0 = arith.constant 0 : i32
    return %arg0, %arg1, %c0_i32 : i32, i32, i32
  }
}

</mosaic_0001>

<bundles_post_ra>
// kernel: double_conv.2
= control target key start
LH: loop header
LB: loop body
LE: loop exit
PB: predicated region body
PF: predicated region fallthrough
CT: control target
= control target key end

     0   :  { %s934_s12 = smov 0   ;;  %s936_s13 = smov 0   ;;  %s1148_s0 = inlined_call_operand.vmem [shape: f32[2,512,128], index: 0, kind: input, shape index: {}]   ;;  %s1149_s1 = inlined_call_operand.vmem [shape: f32[128,128], index: 1, kind: input, shape index: {}]   ;;  %s1150_s2 = inlined_call_operand.vmem [shape: f32[1,128], index: 2, kind: input, shape index: {}]   ;;  %s1151_s3 = inlined_call_operand.vmem [shape: f32[2,512,128], index: 3, kind: output, shape index: {}]  }
   0x1   :  { %s938_s14 = smov 0   ;;  %s940_s15 = smov 0  }
   0x2   :  { %s942_s16 = smov 0  }
   0x3 LB: > { %s22_s17 = sadd.s32 1, %s904_s14  ;;  %s25_s18 = sadd.s32 1, %s908_s15  ;;  %s912_s16 = sphi %s942_s16, %s13_s16   ;;  %s908_s15 = sphi %s940_s15, %s1155_s15   ;;  %s904_s14 = sphi %s938_s14, %s1154_s14   ;;  %s900_s13 = sphi %s936_s13, %s1153_s13   ;;  %s896_s12 = sphi %s934_s12, %s1152_s12  }
   0x4   : > { %p23_p0 = scmp.ge.s32.totalorder %s22_s17, 2  ;;  %p648_p1 = scmp.ge.s32.totalorder %s912_s16, 1 }
   0x5   : > { %p158_p2 = scmp.lt.s32.totalorder %s912_s16, 5 }
   0x6   : > { %s1157_s17 = smov (%p23_p0, %s22_s17), 0  ;;  %s1159_s18 = smov (!%p23_p0, %s25_s18), %s908_s15 }
   0x7   : > { %p159_p3 = pnand %p648_p1, %p158_p2  ;;  %p27_p4 = scmp.ge.s32.totalorder %s1159_s18, 2 }
   0x8   : > { %v242_v0 = vld [vmem:[%s1149_s1] sm:$0xff] (!%p159_p3)  ;;  %v243_v1 = vld [vmem:[%s1149_s1 + $0x8] sm:$0xff] (!%p159_p3)  ;;  %v244_v2 = vld [vmem:[%s1149_s1 + $0x10] sm:$0xff] (!%p159_p3)  ;;  %s649_s25 = sshll.u32 (!%p159_p3), %s896_s12, 5  ;;  %p191_p5 = scmp.lt.s32.totalorder (!%p159_p3), %s900_s13, 1 }
   0x9   : > { %s1161_s18 = smov (%p27_p4, %s1159_s18), 0  ;;  %162 = sbr.rel (%p159_p3) target bundleno = 290 (0x122), region = 32 }
   0xa   : > { %v786_v3 = vpack.c.bf16 (!%p159_p3), %v243_v1, %v242_v0  ;;  %v245_v4 = vld [vmem:[%s1149_s1 + $0x18] sm:$0xff] (!%p159_p3)  ;;  %p193_p6 = scmp.lt.s32.totalorder (!%p159_p3), %s649_s25, 63  ;;  %v246_v6 = vld [vmem:[%s1149_s1 + $0x20] sm:$0xff] (!%p159_p3)  ;;  %v247_v7 = vld [vmem:[%s1149_s1 + $0x28] sm:$0xff] (!%p159_p3) }
   0xb   : > { %v790_v5 = vpack.c.bf16 (!%p159_p3), %v245_v4, %v244_v2  ;;  %v794_v8 = vpack.c.bf16 (!%p159_p3), %v247_v7, %v246_v6  ;;  %v248_v9 = vld [vmem:[%s1149_s1 + $0x30] sm:$0xff] (!%p159_p3)  ;;  %v249_v10 = vld [vmem:[%s1149_s1 + $0x38] sm:$0xff] (!%p159_p3)  ;;  %v250_v14 = vld [vmem:[%s1149_s1 + $0x40] sm:$0xff] (!%p159_p3) }
   0xc   : > { %787 = vmatprep.subr.bf16.mxu0 (!%p159_p3), %v786_v3  ;;  %818 = vmatprep.subr.bf16.mxu1 (!%p159_p3), %v786_v3  ;;  %v798_v13 = vpack.c.bf16 (!%p159_p3), %v249_v10, %v248_v9  ;;  %v251_v15 = vld [vmem:[%s1149_s1 + $0x48] sm:$0xff] (!%p159_p3)  ;;  %v252_v17 = vld [vmem:[%s1149_s1 + $0x50] sm:$0xff] (!%p159_p3)  ;;  %v253_v18 = vld [vmem:[%s1149_s1 + $0x58] sm:$0xff] (!%p159_p3) }
   0xd   : > { %789 = vmatpush3.bf16.msra.mxu0 (!%p159_p3), %v786_v3  ;;  %826 = vmatpush3.bf16.msra.mxu1 (!%p159_p3), %v786_v3  ;;  %v802_v16 = vpack.c.bf16 (!%p159_p3), %v251_v15, %v250_v14  ;;  %v806_v19 = vpack.c.bf16 (!%p159_p3), %v253_v18, %v252_v17  ;;  %v254_v20 = vld [vmem:[%s1149_s1 + $0x60] sm:$0xff] (!%p159_p3)  ;;  %v255_v21 = vld [vmem:[%s1149_s1 + $0x68] sm:$0xff] (!%p159_p3)  ;;  %v256_v23 = vld [vmem:[%s1149_s1 + $0x70] sm:$0xff] (!%p159_p3) }
   0xe   : > { %791 = vmatprep.subr.bf16.mxu0 (!%p159_p3), %v790_v5  ;;  %819 = vmatprep.subr.bf16.mxu1 (!%p159_p3), %v790_v5  ;;  %v810_v22 = vpack.c.bf16 (!%p159_p3), %v255_v21, %v254_v20  ;;  %v257_v24 = vld [vmem:[%s1149_s1 + $0x78] sm:$0xff] (!%p159_p3)  ;;  %v1060_v56 = vld [vmem:[%s1150_s2] ss:$0 sm:$0xff] (!%p159_p3) }
   0xf   : > { %v814_v25 = vpack.c.bf16 (!%p159_p3), %v257_v24, %v256_v23 }
  0x10   : > { %s1163_s13 = smov (!%p191_p5, %s900_s13), 1  ;;  %s1165_s25 = smov (!%p193_p6, %s649_s25), 63 }
  0x11   : > { %s650_s5 = sshll.u32 %s1163_s13, 6  ;;  %793 = vmatpush3.bf16.msra.mxu0 %v790_v5  ;;  %827 = vmatpush3.bf16.msra.mxu1 %v790_v5 }
  0x12   : > { %s985_s6 = sadd.s32 %s650_s5, %s1165_s25  ;;  %795 = vmatprep.subr.bf16.mxu0 %v794_v8  ;;  %820 = vmatprep.subr.bf16.mxu1 %v794_v8 }
  0x13   : > { %s651_s11 = sshll.u32 %s985_s6, 3 }
  0x14   : > { %s999_s13 = scalar_lea.vmem %s1148_s0, %s651_s11 }
  0x15   : > { %v210_v11 = vld [vmem:[%s999_s13] sm:$0xff]  ;;  %797 = vmatpush3.bf16.msra.mxu0 %v794_v8  ;;  %828 = vmatpush3.bf16.msra.mxu1 %v794_v8  ;;  %v211_v26 = vld [vmem:[%s999_s13 + $0x8] sm:$0xff]  ;;  %v212_v28 = vld [vmem:[%s999_s13 + $0x10] sm:$0xff] }
  0x16   : > { %v226_v12 = vld [vmem:[%s999_s13 + $0x80] sm:$0xff]  ;;  %738 = vmatprep.mubr.f32.mxu0 %v210_v11  ;;  %799 = vmatprep.subr.bf16.mxu0 %v798_v13  ;;  %v227_v27 = vld [vmem:[%s999_s13 + $0x88] sm:$0xff]  ;;  %v228_v29 = vld [vmem:[%s999_s13 + $0x90] sm:$0xff] }
  0x17   : > { %762 = vmatprep.mubr.f32.mxu1 %v226_v12  ;;  %821 = vmatprep.subr.bf16.mxu1 %v798_v13  ;;  %v213_v30 = vld [vmem:[%s999_s13 + $0x18] sm:$0xff]  ;;  %v214_v32 = vld [vmem:[%s999_s13 + $0x20] sm:$0xff]  ;;  %v215_v34 = vld [vmem:[%s999_s13 + $0x28] sm:$0xff] }
  0x18   : > { %v229_v31 = vld [vmem:[%s999_s13 + $0x98] sm:$0xff]  ;;  %v230_v33 = vld [vmem:[%s999_s13 + $0xa0] sm:$0xff]  ;;  %v231_v35 = vld [vmem:[%s999_s13 + $0xa8] sm:$0xff] }
  0x19   : > { %801 = vmatpush3.bf16.msra.mxu0 %v798_v13  ;;  %829 = vmatpush3.bf16.msra.mxu1 %v798_v13  ;;  %v216_v36 = vld [vmem:[%s999_s13 + $0x30] sm:$0xff]  ;;  %v217_v38 = vld [vmem:[%s999_s13 + $0x38] sm:$0xff]  ;;  %v218_v40 = vld [vmem:[%s999_s13 + $0x40] sm:$0xff] }
  0x1a   : > { %803 = vmatprep.subr.bf16.mxu0 %v802_v16  ;;  %822 = vmatprep.subr.bf16.mxu1 %v802_v16  ;;  %v232_v37 = vld [vmem:[%s999_s13 + $0xb0] sm:$0xff]  ;;  %v233_v39 = vld [vmem:[%s999_s13 + $0xb8] sm:$0xff]  ;;  %v234_v41 = vld [vmem:[%s999_s13 + $0xc0] sm:$0xff] }
  0x1b   : > { %v219_v42 = vld [vmem:[%s999_s13 + $0x48] sm:$0xff]  ;;  %v220_v44 = vld [vmem:[%s999_s13 + $0x50] sm:$0xff]  ;;  %v221_v46 = vld [vmem:[%s999_s13 + $0x58] sm:$0xff] }
  0x1c   : > { %v235_v43 = vld [vmem:[%s999_s13 + $0xc8] sm:$0xff]  ;;  %v236_v45 = vld [vmem:[%s999_s13 + $0xd0] sm:$0xff]  ;;  %v237_v47 = vld [vmem:[%s999_s13 + $0xd8] sm:$0xff] }
  0x1d   : > { %805 = vmatpush3.bf16.msra.mxu0 %v802_v16  ;;  %830 = vmatpush3.bf16.msra.mxu1 %v802_v16  ;;  %v222_v48 = vld [vmem:[%s999_s13 + $0x60] sm:$0xff]  ;;  %v223_v50 = vld [vmem:[%s999_s13 + $0x68] sm:$0xff]  ;;  %v224_v52 = vld [vmem:[%s999_s13 + $0x70] sm:$0xff] }
  0x1e   : > { %807 = vmatprep.subr.bf16.mxu0 %v806_v19  ;;  %823 = vmatprep.subr.bf16.mxu1 %v806_v19  ;;  %v238_v49 = vld [vmem:[%s999_s13 + $0xe0] sm:$0xff]  ;;  %v239_v51 = vld [vmem:[%s999_s13 + $0xe8] sm:$0xff]  ;;  %v240_v53 = vld [vmem:[%s999_s13 + $0xf0] sm:$0xff] }
  0x1f   : > { %v225_v54 = vld [vmem:[%s999_s13 + $0x78] sm:$0xff] }
  0x20   : > { %v241_v55 = vld [vmem:[%s999_s13 + $0xf8] sm:$0xff]  ;;  %s1069_s13 = scalar_lea.vmem %s1151_s3, %s651_s11 }
  0x21   : > { %809 = vmatpush3.bf16.msra.mxu0 %v806_v19  ;;  %831 = vmatpush3.bf16.msra.mxu1 %v806_v19 }
  0x22   : > { %811 = vmatprep.subr.bf16.mxu0 %v810_v22  ;;  %824 = vmatprep.subr.bf16.mxu1 %v810_v22 }
  0x25   : > { %813 = vmatpush3.bf16.msra.mxu0 %v810_v22  ;;  %832 = vmatpush3.bf16.msra.mxu1 %v810_v22 }
  0x26   : > { %815 = vmatprep.subr.bf16.mxu0 %v814_v25  ;;  %825 = vmatprep.subr.bf16.mxu1 %v814_v25 }
  0x29   : > { %817 = vmatpush3.bf16.msra.mxu0 %v814_v25  ;;  %833 = vmatpush3.bf16.msra.mxu1 %v814_v25 }
  0x2c   : > { %739 = vmatmul.mubr.f32.vlgmr.msra.gmra.mrb[0].mxu0 %v211_v26  ;;  %763 = vmatmul.mubr.f32.vlgmr.msra.gmra.mrb[0].mxu1 %v227_v27 }
  0x2d   : > { %741 = vmatprep.mubr.f32.mxu0 %v212_v28  ;;  %765 = vmatprep.mubr.f32.mxu1 %v228_v29 }
  0x30   : > { %742 = vmatmul.mubr.f32.gmra.mrb[2].mxu0 %v213_v30  ;;  %766 = vmatmul.mubr.f32.gmra.mrb[2].mxu1 %v229_v31 }
  0x31   : > { %744 = vmatprep.mubr.f32.mxu0 %v214_v32  ;;  %768 = vmatprep.mubr.f32.mxu1 %v230_v33 }
  0x34   : > { %745 = vmatmul.mubr.f32.gmra.mrb[4].mxu0 %v215_v34  ;;  %769 = vmatmul.mubr.f32.gmra.mrb[4].mxu1 %v231_v35 }
  0x35   : > { %747 = vmatprep.mubr.f32.mxu0 %v216_v36  ;;  %771 = vmatprep.mubr.f32.mxu1 %v232_v37 }
  0x38   : > { %748 = vmatmul.mubr.f32.gmra.mrb[6].mxu0 %v217_v38  ;;  %772 = vmatmul.mubr.f32.gmra.mrb[6].mxu1 %v233_v39 }
  0x39   : > { %750 = vmatprep.mubr.f32.mxu0 %v218_v40  ;;  %774 = vmatprep.mubr.f32.mxu1 %v234_v41 }
  0x3c   : > { %751 = vmatmul.mubr.f32.gmra.mrb[8].mxu0 %v219_v42  ;;  %775 = vmatmul.mubr.f32.gmra.mrb[8].mxu1 %v235_v43 }
  0x3d   : > { %753 = vmatprep.mubr.f32.mxu0 %v220_v44  ;;  %777 = vmatprep.mubr.f32.mxu1 %v236_v45 }
  0x40   : > { %754 = vmatmul.mubr.f32.gmra.mrb[10].mxu0 %v221_v46  ;;  %778 = vmatmul.mubr.f32.gmra.mrb[10].mxu1 %v237_v47 }
  0x41   : > { %756 = vmatprep.mubr.f32.mxu0 %v222_v48  ;;  %780 = vmatprep.mubr.f32.mxu1 %v238_v49 }
  0x44   : > { %757 = vmatmul.mubr.f32.gmra.mrb[12].mxu0 %v223_v50  ;;  %781 = vmatmul.mubr.f32.gmra.mrb[12].mxu1 %v239_v51 }
  0x45   : > { %759 = vmatprep.mubr.f32.mxu0 %v224_v52  ;;  %783 = vmatprep.mubr.f32.mxu1 %v240_v53 }
  0x48   : > { %760 = vmatmul.mubr.f32.gmra.mrb[14].mxu0 %v225_v54  ;;  %784 = vmatmul.mubr.f32.gmra.mrb[14].mxu1 %v241_v55 }
  0xff   : > { %v740_v57 = vpop.f32.mrb[0].mxu0  ;;  %v764_v58 = vpop.f32.mrb[0].mxu1 }
 0x100   : > { %v337_v59 = vadd.f32 %v740_v57, %v1060_v56  ;;  %v417_v60 = vadd.f32 %v764_v58, %v1060_v56  ;;  %v331_v61 = vpop.f32.mrb[1].mxu0  ;;  %v411_v62 = vpop.f32.mrb[1].mxu1 }
 0x101   : > { %v332_v63 = vadd.f32 %v1060_v56, %v331_v61  ;;  %v412_v0 = vadd.f32 %v1060_v56, %v411_v62 }
 0x102   : > { %v491_v1 = vmax.f32 %v337_v59, 0.0  ;;  %v507_v2 = vmax.f32 %v417_v60, 0.0 }
 0x103   : > { %v490_v3 = vmax.f32 %v332_v63, 0.0  ;;  %v506_v4 = vmax.f32 %v412_v0, 0.0  ;;  %v743_v5 = vpop.f32.mrb[2].mxu0  ;;  %v767_v6 = vpop.f32.mrb[2].mxu1 }
 0x104   : > { %523 = vst [vmem:[%s1069_s13 + $0x8] sm:$0xff] %v491_v1  ;;  %539 = vst [vmem:[%s1069_s13 + $0x88] sm:$0xff] %v507_v2  ;;  %v347_v7 = vadd.f32 %v743_v5, %v1060_v56  ;;  %v427_v8 = vadd.f32 %v767_v6, %v1060_v56  ;;  %v341_v9 = vpop.f32.mrb[3].mxu0  ;;  %v421_v10 = vpop.f32.mrb[3].mxu1 }
 0x105   : > { %522 = vst [vmem:[%s1069_s13] sm:$0xff] %v490_v3  ;;  %538 = vst [vmem:[%s1069_s13 + $0x80] sm:$0xff] %v506_v4  ;;  %v342_v11 = vadd.f32 %v1060_v56, %v341_v9  ;;  %v422_v12 = vadd.f32 %v1060_v56, %v421_v10 }
 0x106   : > { %v493_v13 = vmax.f32 %v347_v7, 0.0  ;;  %v509_v14 = vmax.f32 %v427_v8, 0.0 }
 0x107   : > { %v492_v15 = vmax.f32 %v342_v11, 0.0  ;;  %v508_v16 = vmax.f32 %v422_v12, 0.0  ;;  %v746_v17 = vpop.f32.mrb[4].mxu0  ;;  %v770_v18 = vpop.f32.mrb[4].mxu1 }
 0x108   : > { %525 = vst [vmem:[%s1069_s13 + $0x18] sm:$0xff] %v493_v13  ;;  %541 = vst [vmem:[%s1069_s13 + $0x98] sm:$0xff] %v509_v14  ;;  %v357_v19 = vadd.f32 %v746_v17, %v1060_v56  ;;  %v437_v20 = vadd.f32 %v770_v18, %v1060_v56  ;;  %v351_v21 = vpop.f32.mrb[5].mxu0  ;;  %v431_v22 = vpop.f32.mrb[5].mxu1 }
 0x109   : > { %524 = vst [vmem:[%s1069_s13 + $0x10] sm:$0xff] %v492_v15  ;;  %540 = vst [vmem:[%s1069_s13 + $0x90] sm:$0xff] %v508_v16  ;;  %v352_v23 = vadd.f32 %v1060_v56, %v351_v21  ;;  %v432_v24 = vadd.f32 %v1060_v56, %v431_v22 }
 0x10a   : > { %v495_v25 = vmax.f32 %v357_v19, 0.0  ;;  %v511_v26 = vmax.f32 %v437_v20, 0.0 }
 0x10b   : > { %v494_v27 = vmax.f32 %v352_v23, 0.0  ;;  %v510_v28 = vmax.f32 %v432_v24, 0.0  ;;  %v749_v29 = vpop.f32.mrb[6].mxu0  ;;  %v773_v30 = vpop.f32.mrb[6].mxu1 }
 0x10c   : > { %527 = vst [vmem:[%s1069_s13 + $0x28] sm:$0xff] %v495_v25  ;;  %543 = vst [vmem:[%s1069_s13 + $0xa8] sm:$0xff] %v511_v26  ;;  %v367_v31 = vadd.f32 %v749_v29, %v1060_v56  ;;  %v447_v32 = vadd.f32 %v773_v30, %v1060_v56  ;;  %v361_v33 = vpop.f32.mrb[7].mxu0  ;;  %v441_v34 = vpop.f32.mrb[7].mxu1 }
 0x10d   : > { %526 = vst [vmem:[%s1069_s13 + $0x20] sm:$0xff] %v494_v27  ;;  %542 = vst [vmem:[%s1069_s13 + $0xa0] sm:$0xff] %v510_v28  ;;  %v362_v35 = vadd.f32 %v1060_v56, %v361_v33  ;;  %v442_v36 = vadd.f32 %v1060_v56, %v441_v34 }
 0x10e   : > { %v497_v37 = vmax.f32 %v367_v31, 0.0  ;;  %v513_v38 = vmax.f32 %v447_v32, 0.0 }
 0x10f   : > { %v496_v39 = vmax.f32 %v362_v35, 0.0  ;;  %v512_v40 = vmax.f32 %v442_v36, 0.0  ;;  %v752_v41 = vpop.f32.mrb[8].mxu0  ;;  %v776_v42 = vpop.f32.mrb[8].mxu1 }
 0x110   : > { %529 = vst [vmem:[%s1069_s13 + $0x38] sm:$0xff] %v497_v37  ;;  %545 = vst [vmem:[%s1069_s13 + $0xb8] sm:$0xff] %v513_v38  ;;  %v377_v43 = vadd.f32 %v752_v41, %v1060_v56  ;;  %v457_v44 = vadd.f32 %v776_v42, %v1060_v56  ;;  %v371_v45 = vpop.f32.mrb[9].mxu0  ;;  %v451_v46 = vpop.f32.mrb[9].mxu1 }
 0x111   : > { %528 = vst [vmem:[%s1069_s13 + $0x30] sm:$0xff] %v496_v39  ;;  %544 = vst [vmem:[%s1069_s13 + $0xb0] sm:$0xff] %v512_v40  ;;  %v372_v47 = vadd.f32 %v1060_v56, %v371_v45  ;;  %v452_v48 = vadd.f32 %v1060_v56, %v451_v46 }
 0x112   : > { %v499_v49 = vmax.f32 %v377_v43, 0.0  ;;  %v515_v50 = vmax.f32 %v457_v44, 0.0 }
 0x113   : > { %v498_v51 = vmax.f32 %v372_v47, 0.0  ;;  %v514_v52 = vmax.f32 %v452_v48, 0.0  ;;  %v755_v53 = vpop.f32.mrb[10].mxu0  ;;  %v779_v54 = vpop.f32.mrb[10].mxu1 }
 0x114   : > { %531 = vst [vmem:[%s1069_s13 + $0x48] sm:$0xff] %v499_v49  ;;  %547 = vst [vmem:[%s1069_s13 + $0xc8] sm:$0xff] %v515_v50  ;;  %v387_v55 = vadd.f32 %v755_v53, %v1060_v56  ;;  %v467_v57 = vadd.f32 %v779_v54, %v1060_v56  ;;  %v381_v58 = vpop.f32.mrb[11].mxu0  ;;  %v461_v59 = vpop.f32.mrb[11].mxu1 }
 0x115   : > { %530 = vst [vmem:[%s1069_s13 + $0x40] sm:$0xff] %v498_v51  ;;  %546 = vst [vmem:[%s1069_s13 + $0xc0] sm:$0xff] %v514_v52  ;;  %v382_v60 = vadd.f32 %v1060_v56, %v381_v58  ;;  %v462_v61 = vadd.f32 %v1060_v56, %v461_v59 }
 0x116   : > { %v501_v62 = vmax.f32 %v387_v55, 0.0  ;;  %v517_v63 = vmax.f32 %v467_v57, 0.0 }
 0x117   : > { %v500_v0 = vmax.f32 %v382_v60, 0.0  ;;  %v516_v1 = vmax.f32 %v462_v61, 0.0  ;;  %v758_v2 = vpop.f32.mrb[12].mxu0  ;;  %v782_v3 = vpop.f32.mrb[12].mxu1 }
 0x118   : > { %533 = vst [vmem:[%s1069_s13 + $0x58] sm:$0xff] %v501_v62  ;;  %549 = vst [vmem:[%s1069_s13 + $0xd8] sm:$0xff] %v517_v63  ;;  %v397_v4 = vadd.f32 %v758_v2, %v1060_v56  ;;  %v477_v5 = vadd.f32 %v782_v3, %v1060_v56  ;;  %v391_v6 = vpop.f32.mrb[13].mxu0  ;;  %v471_v7 = vpop.f32.mrb[13].mxu1 }
 0x119   : > { %532 = vst [vmem:[%s1069_s13 + $0x50] sm:$0xff] %v500_v0  ;;  %548 = vst [vmem:[%s1069_s13 + $0xd0] sm:$0xff] %v516_v1  ;;  %v392_v8 = vadd.f32 %v1060_v56, %v391_v6  ;;  %v472_v9 = vadd.f32 %v1060_v56, %v471_v7 }
 0x11a   : > { %v503_v10 = vmax.f32 %v397_v4, 0.0  ;;  %v519_v11 = vmax.f32 %v477_v5, 0.0 }
 0x11b   : > { %v502_v12 = vmax.f32 %v392_v8, 0.0  ;;  %v518_v13 = vmax.f32 %v472_v9, 0.0  ;;  %v761_v14 = vpop.f32.mrb[14].mxu0  ;;  %v785_v15 = vpop.f32.mrb[14].mxu1 }
 0x11c   : > { %535 = vst [vmem:[%s1069_s13 + $0x68] sm:$0xff] %v503_v10  ;;  %551 = vst [vmem:[%s1069_s13 + $0xe8] sm:$0xff] %v519_v11  ;;  %v407_v16 = vadd.f32 %v761_v14, %v1060_v56  ;;  %v487_v17 = vadd.f32 %v785_v15, %v1060_v56  ;;  %v401_v18 = vpop.f32.mrb[15].mxu0  ;;  %v481_v19 = vpop.f32.mrb[15].mxu1 }
 0x11d   : > { %534 = vst [vmem:[%s1069_s13 + $0x60] sm:$0xff] %v502_v12  ;;  %550 = vst [vmem:[%s1069_s13 + $0xe0] sm:$0xff] %v518_v13  ;;  %v402_v20 = vadd.f32 %v1060_v56, %v401_v18  ;;  %v482_v21 = vadd.f32 %v1060_v56, %v481_v19 }
 0x11e   : > { %v505_v22 = vmax.f32 %v407_v16, 0.0  ;;  %v521_v23 = vmax.f32 %v487_v17, 0.0 }
 0x11f   : > { %v504_v24 = vmax.f32 %v402_v20, 0.0  ;;  %v520_v25 = vmax.f32 %v482_v21, 0.0 }
 0x120   : > { %537 = vst [vmem:[%s1069_s13 + $0x78] sm:$0xff] %v505_v22  ;;  %553 = vst [vmem:[%s1069_s13 + $0xf8] sm:$0xff] %v521_v23 }
 0x121   : > { %536 = vst [vmem:[%s1069_s13 + $0x70] sm:$0xff] %v504_v24  ;;  %552 = vst [vmem:[%s1069_s13 + $0xf0] sm:$0xff] %v520_v25 }
 0x122 PF: > { %s13_s16 = sadd.s32 1, %s912_s16   ;;  %s1152_s12 = smov %s904_s14 }
 0x123   : > { %p10_p7 = scmp.ge.s32.totalorder %s13_s16, 6   ;;  %s1153_s13 = smov %s908_s15 }
 0x124   : > { %s1154_s14 = smov %s1157_s17  ;;  %s1155_s15 = smov %s1161_s18 }
 0x125   :  { %12 = sbr.rel (!%p10_p7) target bundleno = 3 (0x3), region = 62 }

// kernel: double_conv.3
= control target key start
LH: loop header
LB: loop body
LE: loop exit
PB: predicated region body
PF: predicated region fallthrough
CT: control target
= control target key end

     0   :  { %s895_s12 = smov 0   ;;  %s897_s13 = smov 0   ;;  %s1217_s0 = inlined_call_operand.vmem [shape: f32[2,512,256], index: 0, kind: input, shape index: {}]   ;;  %s1218_s1 = inlined_call_operand.vmem [shape: f32[256,128], index: 1, kind: input, shape index: {}]   ;;  %s1219_s2 = inlined_call_operand.vmem [shape: f32[1,128], index: 2, kind: input, shape index: {}]   ;;  %s1220_s3 = inlined_call_operand.vmem [shape: f32[2,512,128], index: 3, kind: output, shape index: {}]  }
   0x1   :  { %s899_s14 = smov 0   ;;  %s901_s15 = smov 0  }
   0x2   :  { %s903_s16 = smov 0  }
   0x3 LB: > { %s22_s17 = sadd.s32 1, %s864_s14  ;;  %s25_s18 = sadd.s32 1, %s868_s15  ;;  %s872_s16 = sphi %s903_s16, %s13_s16   ;;  %s868_s15 = sphi %s901_s15, %s1224_s15   ;;  %s864_s14 = sphi %s899_s14, %s1223_s14   ;;  %s860_s13 = sphi %s897_s13, %s1222_s13   ;;  %s856_s12 = sphi %s895_s12, %s1221_s12  }
   0x4   : > { %p23_p0 = scmp.ge.s32.totalorder %s22_s17, 2  ;;  %p702_p1 = scmp.ge.s32.totalorder %s872_s16, 1 }
   0x5   : > { %p159_p2 = scmp.lt.s32.totalorder %s872_s16, 5 }
   0x6   : > { %s1226_s17 = smov (%p23_p0, %s22_s17), 0  ;;  %s1228_s18 = smov (!%p23_p0, %s25_s18), %s868_s15 }
   0x7   : > { %p160_p3 = pnand %p702_p1, %p159_p2  ;;  %p27_p4 = scmp.ge.s32.totalorder %s1228_s18, 2 }
   0x8   : > { %v277_v0 = vld [vmem:[%s1218_s1] sm:$0xff] (!%p160_p3)  ;;  %v278_v1 = vld [vmem:[%s1218_s1 + $0x8] sm:$0xff] (!%p160_p3)  ;;  %v279_v2 = vld [vmem:[%s1218_s1 + $0x10] sm:$0xff] (!%p160_p3)  ;;  %s703_s25 = sshll.u32 (!%p160_p3), %s856_s12, 5  ;;  %p193_p5 = scmp.lt.s32.totalorder (!%p160_p3), %s860_s13, 1  ;;  %v874_v3 = vmov (!%p160_p3), 0.0|0.0  }
   0x9   : > { %s1230_s18 = smov (%p27_p4, %s1228_s18), 0  ;;  %163 = sbr.rel (%p160_p3) target bundleno = 353 (0x161), region = 32 }
   0xa   : > { %713 = vmatprep.subr.bf16.mxu0 (!%p160_p3), %v874_v3  ;;  %761 = vmatprep.subr.bf16.mxu1 (!%p160_p3), %v874_v3  ;;  %v714_v4 = vpack.c.bf16 (!%p160_p3), %v278_v1, %v277_v0  ;;  %v280_v5 = vld [vmem:[%s1218_s1 + $0x18] sm:$0xff] (!%p160_p3)  ;;  %p195_p6 = scmp.lt.s32.totalorder (!%p160_p3), %s703_s25, 63  ;;  %v281_v7 = vld [vmem:[%s1218_s1 + $0x20] sm:$0xff] (!%p160_p3)  ;;  %v282_v8 = vld [vmem:[%s1218_s1 + $0x28] sm:$0xff] (!%p160_p3) }
   0xb   : > { %v717_v6 = vpack.c.bf16 (!%p160_p3), %v280_v5, %v279_v2  ;;  %v720_v9 = vpack.c.bf16 (!%p160_p3), %v282_v8, %v281_v7  ;;  %v283_v10 = vld [vmem:[%s1218_s1 + $0x30] sm:$0xff] (!%p160_p3)  ;;  %v284_v11 = vld [vmem:[%s1218_s1 + $0x38] sm:$0xff] (!%p160_p3)  ;;  %v285_v15 = vld [vmem:[%s1218_s1 + $0x40] sm:$0xff] (!%p160_p3) }
   0xc   : > { %715 = vmatpush1.bf16.msra.mxu0 (!%p160_p3), %v714_v4  ;;  %777 = vmatpush1.bf16.msra.mxu1 (!%p160_p3), %v714_v4  ;;  %v723_v13 = vpack.c.bf16 (!%p160_p3), %v284_v11, %v283_v10  ;;  %v286_v16 = vld [vmem:[%s1218_s1 + $0x48] sm:$0xff] (!%p160_p3)  ;;  %v287_v18 = vld [vmem:[%s1218_s1 + $0x50] sm:$0xff] (!%p160_p3)  ;;  %v288_v19 = vld [vmem:[%s1218_s1 + $0x58] sm:$0xff] (!%p160_p3) }
   0xd   : > { %716 = vmatprep.subr.bf16.mxu0 (!%p160_p3), %v874_v3  ;;  %762 = vmatprep.subr.bf16.mxu1 (!%p160_p3), %v874_v3  ;;  %v726_v17 = vpack.c.bf16 (!%p160_p3), %v286_v16, %v285_v15  ;;  %v729_v20 = vpack.c.bf16 (!%p160_p3), %v288_v19, %v287_v18  ;;  %v289_v21 = vld [vmem:[%s1218_s1 + $0x60] sm:$0xff] (!%p160_p3)  ;;  %v290_v22 = vld [vmem:[%s1218_s1 + $0x68] sm:$0xff] (!%p160_p3)  ;;  %v291_v24 = vld [vmem:[%s1218_s1 + $0x70] sm:$0xff] (!%p160_p3) }
   0xe   : > { %v732_v23 = vpack.c.bf16 (!%p160_p3), %v290_v22, %v289_v21  ;;  %v292_v25 = vld [vmem:[%s1218_s1 + $0x78] sm:$0xff] (!%p160_p3)  ;;  %v293_v27 = vld [vmem:[%s1218_s1 + $0x80] sm:$0xff] (!%p160_p3)  ;;  %v294_v28 = vld [vmem:[%s1218_s1 + $0x88] sm:$0xff] (!%p160_p3) }
   0xf   : > { %v735_v26 = vpack.c.bf16 (!%p160_p3), %v292_v25, %v291_v24  ;;  %v738_v29 = vpack.c.bf16 (!%p160_p3), %v294_v28, %v293_v27  ;;  %v295_v30 = vld [vmem:[%s1218_s1 + $0x90] sm:$0xff] (!%p160_p3)  ;;  %v296_v31 = vld [vmem:[%s1218_s1 + $0x98] sm:$0xff] (!%p160_p3)  ;;  %v297_v33 = vld [vmem:[%s1218_s1 + $0xa0] sm:$0xff] (!%p160_p3) }
  0x10   : > { %s1232_s13 = smov (!%p193_p5, %s860_s13), 1  ;;  %s1234_s25 = smov (!%p195_p6, %s703_s25), 63  ;;  %718 = vmatpush1.bf16.msra.mxu0 %v717_v6  ;;  %778 = vmatpush1.bf16.msra.mxu1 %v717_v6  ;;  %v741_v32 = vpack.c.bf16 %v296_v31, %v295_v30  ;;  %v298_v34 = vld [vmem:[%s1218_s1 + $0xa8] sm:$0xff]  ;;  %v299_v36 = vld [vmem:[%s1218_s1 + $0xb0] sm:$0xff]  ;;  %v300_v37 = vld [vmem:[%s1218_s1 + $0xb8] sm:$0xff] }
  0x11   : > { %s705_s5 = sshll.u32 %s1232_s13, 7  ;;  %s708_s6 = sshll.u32 %s1232_s13, 6  ;;  %719 = vmatprep.subr.bf16.mxu0 %v874_v3  ;;  %763 = vmatprep.subr.bf16.mxu1 %v874_v3  ;;  %v744_v35 = vpack.c.bf16 %v298_v34, %v297_v33  ;;  %v747_v38 = vpack.c.bf16 %v300_v37, %v299_v36  ;;  %v301_v39 = vld [vmem:[%s1218_s1 + $0xc0] sm:$0xff]  ;;  %v302_v40 = vld [vmem:[%s1218_s1 + $0xc8] sm:$0xff]  ;;  %v303_v42 = vld [vmem:[%s1218_s1 + $0xd0] sm:$0xff] }
  0x12   : > { %s704_s7 = sshll.u32 %s1234_s25, 1  ;;  %s950_s8 = sadd.s32 %s708_s6, %s1234_s25  ;;  %v750_v41 = vpack.c.bf16 %v302_v40, %v301_v39  ;;  %v304_v43 = vld [vmem:[%s1218_s1 + $0xd8] sm:$0xff]  ;;  %v305_v45 = vld [vmem:[%s1218_s1 + $0xe0] sm:$0xff]  ;;  %v306_v46 = vld [vmem:[%s1218_s1 + $0xe8] sm:$0xff] }
  0x13   : > { %s199_s9 = sadd.s32 %s705_s5, %s704_s7  ;;  %v753_v44 = vpack.c.bf16 %v304_v43, %v303_v42  ;;  %v756_v47 = vpack.c.bf16 %v306_v46, %v305_v45  ;;  %v307_v48 = vld [vmem:[%s1218_s1 + $0xf0] sm:$0xff]  ;;  %v308_v49 = vld [vmem:[%s1218_s1 + $0xf8] sm:$0xff]  ;;  %s709_s6 = sshll.u32 %s950_s8, 3 }
  0x14   : > { %s706_s10 = sshll.u32 %s199_s9, 3  ;;  %721 = vmatpush1.bf16.msra.mxu0 %v720_v9  ;;  %779 = vmatpush1.bf16.msra.mxu1 %v720_v9  ;;  %v759_v50 = vpack.c.bf16 %v308_v49, %v307_v48  ;;  %v1130_v49 = vld [vmem:[%s1219_s2] ss:$0 sm:$0xff] }
  0x15   : > { %s963_s22 = scalar_lea.vmem %s1217_s0, %s706_s10  ;;  %722 = vmatprep.subr.bf16.mxu0 %v874_v3  ;;  %764 = vmatprep.subr.bf16.mxu1 %v874_v3 }
  0x16   : > { %v214_v12 = vld [vmem:[%s963_s22 + $0x8] sm:$0xff]  ;;  %v213_v51 = vld [vmem:[%s963_s22] sm:$0xff]  ;;  %v216_v53 = vld [vmem:[%s963_s22 + $0x18] sm:$0xff] }
  0x17   : > { %v246_v14 = vld [vmem:[%s963_s22 + $0x108] sm:$0xff]  ;;  %380 = vmatprep.mubr.f32.mxu0 %v214_v12  ;;  %v245_v52 = vld [vmem:[%s963_s22 + $0x100] sm:$0xff]  ;;  %v248_v54 = vld [vmem:[%s963_s22 + $0x118] sm:$0xff] }
  0x18   : > { %460 = vmatprep.mubr.f32.mxu1 %v246_v14  ;;  %724 = vmatpush1.bf16.msra.mxu0 %v723_v13  ;;  %v215_v55 = vld [vmem:[%s963_s22 + $0x10] sm:$0xff]  ;;  %v218_v57 = vld [vmem:[%s963_s22 + $0x28] sm:$0xff]  ;;  %v217_v59 = vld [vmem:[%s963_s22 + $0x20] sm:$0xff] }
  0x19   : > { %780 = vmatpush1.bf16.msra.mxu1 %v723_v13  ;;  %725 = vmatprep.subr.bf16.mxu0 %v874_v3  ;;  %v247_v56 = vld [vmem:[%s963_s22 + $0x110] sm:$0xff]  ;;  %v250_v58 = vld [vmem:[%s963_s22 + $0x128] sm:$0xff]  ;;  %v249_v60 = vld [vmem:[%s963_s22 + $0x120] sm:$0xff] }
  0x1a   : > { %765 = vmatprep.subr.bf16.mxu1 %v874_v3  ;;  %v220_v61 = vld [vmem:[%s963_s22 + $0x38] sm:$0xff]  ;;  %v219_v63 = vld [vmem:[%s963_s22 + $0x30] sm:$0xff]  ;;  %v222_v1 = vld [vmem:[%s963_s22 + $0x48] sm:$0xff] }
  0x1b   : > { %v252_v62 = vld [vmem:[%s963_s22 + $0x138] sm:$0xff]  ;;  %v251_v0 = vld [vmem:[%s963_s22 + $0x130] sm:$0xff]  ;;  %v254_v2 = vld [vmem:[%s963_s22 + $0x148] sm:$0xff] }
  0x1c   : > { %727 = vmatpush1.bf16.msra.mxu0 %v726_v17  ;;  %v253_v4 = vld [vmem:[%s963_s22 + $0x140] sm:$0xff]  ;;  %v224_v5 = vld [vmem:[%s963_s22 + $0x58] sm:$0xff]  ;;  %v223_v7 = vld [vmem:[%s963_s22 + $0x50] sm:$0xff] }
  0x1d   : > { %781 = vmatpush1.bf16.msra.mxu1 %v726_v17  ;;  %728 = vmatprep.subr.bf16.mxu0 %v874_v3  ;;  %v256_v6 = vld [vmem:[%s963_s22 + $0x158] sm:$0xff]  ;;  %v255_v8 = vld [vmem:[%s963_s22 + $0x150] sm:$0xff]  ;;  %v226_v9 = vld [vmem:[%s963_s22 + $0x68] sm:$0xff] }
  0x1e   : > { %766 = vmatprep.subr.bf16.mxu1 %v874_v3  ;;  %v258_v10 = vld [vmem:[%s963_s22 + $0x168] sm:$0xff]  ;;  %v225_v11 = vld [vmem:[%s963_s22 + $0x60] sm:$0xff]  ;;  %v228_v13 = vld [vmem:[%s963_s22 + $0x78] sm:$0xff] }
  0x1f   : > { %v257_v12 = vld [vmem:[%s963_s22 + $0x160] sm:$0xff]  ;;  %v260_v14 = vld [vmem:[%s963_s22 + $0x178] sm:$0xff]  ;;  %v227_v15 = vld [vmem:[%s963_s22 + $0x70] sm:$0xff] }
  0x20   : > { %730 = vmatpush1.bf16.msra.mxu0 %v729_v20  ;;  %v259_v16 = vld [vmem:[%s963_s22 + $0x170] sm:$0xff]  ;;  %v230_v17 = vld [vmem:[%s963_s22 + $0x88] sm:$0xff]  ;;  %v229_v19 = vld [vmem:[%s963_s22 + $0x80] sm:$0xff] }
  0x21   : > { %782 = vmatpush1.bf16.msra.mxu1 %v729_v20  ;;  %731 = vmatprep.subr.bf16.mxu0 %v874_v3  ;;  %v262_v18 = vld [vmem:[%s963_s22 + $0x188] sm:$0xff]  ;;  %v261_v20 = vld [vmem:[%s963_s22 + $0x180] sm:$0xff]  ;;  %v232_v21 = vld [vmem:[%s963_s22 + $0x98] sm:$0xff] }
  0x22   : > { %767 = vmatprep.subr.bf16.mxu1 %v874_v3  ;;  %v264_v22 = vld [vmem:[%s963_s22 + $0x198] sm:$0xff]  ;;  %v263_v24 = vld [vmem:[%s963_s22 + $0x190] sm:$0xff]  ;;  %v234_v25 = vld [vmem:[%s963_s22 + $0xa8] sm:$0xff] }
  0x23   : > { %v233_v27 = vld [vmem:[%s963_s22 + $0xa0] sm:$0xff]  ;;  %v268_v30 = vld [vmem:[%s963_s22 + $0x1b8] sm:$0xff]  ;;  %v235_v31 = vld [vmem:[%s963_s22 + $0xb0] sm:$0xff] }
  0x24   : > { %733 = vmatpush1.bf16.msra.mxu0 %v732_v23  ;;  %v265_v28 = vld [vmem:[%s963_s22 + $0x1a0] sm:$0xff]  ;;  %v238_v33 = vld [vmem:[%s963_s22 + $0xc8] sm:$0xff]  ;;  %v240_v37 = vld [vmem:[%s963_s22 + $0xd8] sm:$0xff] }
  0x25   : > { %783 = vmatpush1.bf16.msra.mxu1 %v732_v23  ;;  %734 = vmatprep.subr.bf16.mxu0 %v874_v3  ;;  %v231_v23 = vld [vmem:[%s963_s22 + $0x90] sm:$0xff]  ;;  %v270_v34 = vld [vmem:[%s963_s22 + $0x1c8] sm:$0xff]  ;;  %v269_v36 = vld [vmem:[%s963_s22 + $0x1c0] sm:$0xff] }
  0x26   : > { %768 = vmatprep.subr.bf16.mxu1 %v874_v3  ;;  %v239_v39 = vld [vmem:[%s963_s22 + $0xd0] sm:$0xff]  ;;  %v274_v42 = vld [vmem:[%s963_s22 + $0x1e8] sm:$0xff]  ;;  %v241_v43 = vld [vmem:[%s963_s22 + $0xe0] sm:$0xff] }
  0x27   : > { %v271_v40 = vld [vmem:[%s963_s22 + $0x1d0] sm:$0xff]  ;;  %v244_v45 = vld [vmem:[%s963_s22 + $0xf8] sm:$0xff] }
  0x28   : > { %736 = vmatpush1.bf16.msra.mxu0 %v735_v26  ;;  %v276_v46 = vld [vmem:[%s963_s22 + $0x1f8] sm:$0xff]  ;;  %v275_v48 = vld [vmem:[%s963_s22 + $0x1f0] sm:$0xff] }
  0x29   : > { %784 = vmatpush1.bf16.msra.mxu1 %v735_v26  ;;  %737 = vmatprep.subr.bf16.mxu0 %v874_v3  ;;  %v266_v26 = vld [vmem:[%s963_s22 + $0x1a8] sm:$0xff] }
  0x2a   : > { %769 = vmatprep.subr.bf16.mxu1 %v874_v3 }
  0x2c   : > { %739 = vmatpush1.bf16.msra.mxu0 %v738_v29 }
  0x2d   : > { %785 = vmatpush1.bf16.msra.mxu1 %v738_v29  ;;  %740 = vmatprep.subr.bf16.mxu0 %v874_v3  ;;  %v236_v29 = vld [vmem:[%s963_s22 + $0xb8] sm:$0xff] }
  0x2e   : > { %770 = vmatprep.subr.bf16.mxu1 %v874_v3 }
  0x30   : > { %742 = vmatpush1.bf16.msra.mxu0 %v741_v32 }
  0x31   : > { %786 = vmatpush1.bf16.msra.mxu1 %v741_v32  ;;  %743 = vmatprep.subr.bf16.mxu0 %v874_v3  ;;  %v267_v32 = vld [vmem:[%s963_s22 + $0x1b0] sm:$0xff] }
  0x32   : > { %771 = vmatprep.subr.bf16.mxu1 %v874_v3 }
  0x34   : > { %745 = vmatpush1.bf16.msra.mxu0 %v744_v35 }
  0x35   : > { %787 = vmatpush1.bf16.msra.mxu1 %v744_v35  ;;  %746 = vmatprep.subr.bf16.mxu0 %v874_v3  ;;  %v237_v35 = vld [vmem:[%s963_s22 + $0xc0] sm:$0xff] }
  0x36   : > { %772 = vmatprep.subr.bf16.mxu1 %v874_v3 }
  0x38   : > { %748 = vmatpush1.bf16.msra.mxu0 %v747_v38 }
  0x39   : > { %788 = vmatpush1.bf16.msra.mxu1 %v747_v38  ;;  %749 = vmatprep.subr.bf16.mxu0 %v874_v3  ;;  %v272_v38 = vld [vmem:[%s963_s22 + $0x1d8] sm:$0xff] }
  0x3a   : > { %773 = vmatprep.subr.bf16.mxu1 %v874_v3 }
  0x3c   : > { %751 = vmatpush1.bf16.msra.mxu0 %v750_v41 }
  0x3d   : > { %789 = vmatpush1.bf16.msra.mxu1 %v750_v41  ;;  %752 = vmatprep.subr.bf16.mxu0 %v874_v3  ;;  %v242_v41 = vld [vmem:[%s963_s22 + $0xe8] sm:$0xff] }
  0x3e   : > { %774 = vmatprep.subr.bf16.mxu1 %v874_v3 }
  0x40   : > { %754 = vmatpush1.bf16.msra.mxu0 %v753_v44 }
  0x41   : > { %790 = vmatpush1.bf16.msra.mxu1 %v753_v44  ;;  %755 = vmatprep.subr.bf16.mxu0 %v874_v3  ;;  %v273_v44 = vld [vmem:[%s963_s22 + $0x1e0] sm:$0xff] }
  0x42   : > { %775 = vmatprep.subr.bf16.mxu1 %v874_v3 }
  0x44   : > { %757 = vmatpush1.bf16.msra.mxu0 %v756_v47 }
  0x45   : > { %791 = vmatpush1.bf16.msra.mxu1 %v756_v47  ;;  %758 = vmatprep.subr.bf16.mxu0 %v874_v3  ;;  %v243_v47 = vld [vmem:[%s963_s22 + $0xf0] sm:$0xff] }
  0x46   : > { %776 = vmatprep.subr.bf16.mxu1 %v874_v3  ;;  %v221_v3 = vld [vmem:[%s963_s22 + $0x40] sm:$0xff]  ;;  %s1138_s22 = scalar_lea.vmem %s1220_s3, %s709_s6 }
  0x48   : > { %760 = vmatpush1.bf16.msra.mxu0 %v759_v50 }
  0x49   : > { %792 = vmatpush1.bf16.msra.mxu1 %v759_v50 }
  0x4b   : > { %381 = vmatmul.mubr.f32.vlgmr.msra.gmra.mrb[0].mxu0 %v213_v51 }
  0x4c   : > { %461 = vmatmul.mubr.f32.vlgmr.msra.gmra.mrb[0].mxu1 %v245_v52  ;;  %385 = vmatprep.mubr.f32.mxu0 %v216_v53 }
  0x4d   : > { %465 = vmatprep.mubr.f32.mxu1 %v248_v54 }
  0x4f   : > { %386 = vmatmul.mubr.f32.gmra.mrb[2].mxu0 %v215_v55 }
  0x50   : > { %466 = vmatmul.mubr.f32.gmra.mrb[2].mxu1 %v247_v56  ;;  %390 = vmatprep.mubr.f32.mxu0 %v218_v57 }
  0x51   : > { %470 = vmatprep.mubr.f32.mxu1 %v250_v58 }
  0x53   : > { %391 = vmatmul.mubr.f32.gmra.mrb[4].mxu0 %v217_v59 }
  0x54   : > { %471 = vmatmul.mubr.f32.gmra.mrb[4].mxu1 %v249_v60  ;;  %395 = vmatprep.mubr.f32.mxu0 %v220_v61 }
  0x55   : > { %475 = vmatprep.mubr.f32.mxu1 %v252_v62 }
  0x57   : > { %396 = vmatmul.mubr.f32.gmra.mrb[6].mxu0 %v219_v63 }
  0x58   : > { %476 = vmatmul.mubr.f32.gmra.mrb[6].mxu1 %v251_v0  ;;  %400 = vmatprep.mubr.f32.mxu0 %v222_v1 }
  0x59   : > { %480 = vmatprep.mubr.f32.mxu1 %v254_v2 }
  0x5b   : > { %401 = vmatmul.mubr.f32.gmra.mrb[8].mxu0 %v221_v3 }
  0x5c   : > { %481 = vmatmul.mubr.f32.gmra.mrb[8].mxu1 %v253_v4  ;;  %405 = vmatprep.mubr.f32.mxu0 %v224_v5 }
  0x5d   : > { %485 = vmatprep.mubr.f32.mxu1 %v256_v6 }
  0x5f   : > { %406 = vmatmul.mubr.f32.gmra.mrb[10].mxu0 %v223_v7 }
  0x60   : > { %486 = vmatmul.mubr.f32.gmra.mrb[10].mxu1 %v255_v8  ;;  %410 = vmatprep.mubr.f32.mxu0 %v226_v9 }
  0x61   : > { %490 = vmatprep.mubr.f32.mxu1 %v258_v10 }
  0x63   : > { %411 = vmatmul.mubr.f32.gmra.mrb[12].mxu0 %v225_v11 }
  0x64   : > { %491 = vmatmul.mubr.f32.gmra.mrb[12].mxu1 %v257_v12  ;;  %415 = vmatprep.mubr.f32.mxu0 %v228_v13 }
  0x65   : > { %495 = vmatprep.mubr.f32.mxu1 %v260_v14 }
  0x67   : > { %416 = vmatmul.mubr.f32.gmra.mrb[14].mxu0 %v227_v15 }
  0x68   : > { %496 = vmatmul.mubr.f32.gmra.mrb[14].mxu1 %v259_v16  ;;  %420 = vmatprep.mubr.f32.mxu0 %v230_v17 }
  0x69   : > { %500 = vmatprep.mubr.f32.mxu1 %v262_v18 }
  0x6b   : > { %421 = vmatmul.mubr.f32.gmra.mrb[16].mxu0 %v229_v19 }
  0x6c   : > { %501 = vmatmul.mubr.f32.gmra.mrb[16].mxu1 %v261_v20  ;;  %425 = vmatprep.mubr.f32.mxu0 %v232_v21 }
  0x6d   : > { %505 = vmatprep.mubr.f32.mxu1 %v264_v22 }
  0x6f   : > { %426 = vmatmul.mubr.f32.gmra.mrb[18].mxu0 %v231_v23 }
  0x70   : > { %506 = vmatmul.mubr.f32.gmra.mrb[18].mxu1 %v263_v24  ;;  %430 = vmatprep.mubr.f32.mxu0 %v234_v25 }
  0x71   : > { %510 = vmatprep.mubr.f32.mxu1 %v266_v26 }
  0x73   : > { %431 = vmatmul.mubr.f32.gmra.mrb[20].mxu0 %v233_v27 }
  0x74   : > { %511 = vmatmul.mubr.f32.gmra.mrb[20].mxu1 %v265_v28  ;;  %435 = vmatprep.mubr.f32.mxu0 %v236_v29 }
  0x75   : > { %515 = vmatprep.mubr.f32.mxu1 %v268_v30 }
  0x77   : > { %436 = vmatmul.mubr.f32.gmra.mrb[22].mxu0 %v235_v31 }
  0x78   : > { %516 = vmatmul.mubr.f32.gmra.mrb[22].mxu1 %v267_v32  ;;  %440 = vmatprep.mubr.f32.mxu0 %v238_v33 }
  0x79   : > { %520 = vmatprep.mubr.f32.mxu1 %v270_v34 }
  0x7b   : > { %441 = vmatmul.mubr.f32.gmra.mrb[24].mxu0 %v237_v35 }
  0x7c   : > { %521 = vmatmul.mubr.f32.gmra.mrb[24].mxu1 %v269_v36  ;;  %445 = vmatprep.mubr.f32.mxu0 %v240_v37 }
  0x7d   : > { %525 = vmatprep.mubr.f32.mxu1 %v272_v38 }
  0x7f   : > { %446 = vmatmul.mubr.f32.gmra.mrb[26].mxu0 %v239_v39 }
  0x80   : > { %526 = vmatmul.mubr.f32.gmra.mrb[26].mxu1 %v271_v40  ;;  %450 = vmatprep.mubr.f32.mxu0 %v242_v41 }
  0x81   : > { %530 = vmatprep.mubr.f32.mxu1 %v274_v42 }
  0x83   : > { %451 = vmatmul.mubr.f32.gmra.mrb[28].mxu0 %v241_v43 }
  0x84   : > { %531 = vmatmul.mubr.f32.gmra.mrb[28].mxu1 %v273_v44  ;;  %455 = vmatprep.mubr.f32.mxu0 %v244_v45 }
  0x85   : > { %535 = vmatprep.mubr.f32.mxu1 %v276_v46 }
  0x87   : > { %456 = vmatmul.mubr.f32.gmra.mrb[30].mxu0 %v243_v47 }
  0x88   : > { %536 = vmatmul.mubr.f32.gmra.mrb[30].mxu1 %v275_v48 }
 0x11e   : > { %v382_v50 = vpop.f32.mrb[0].mxu0 }
 0x11f   : > { %v462_v51 = vpop.f32.mrb[0].mxu1  ;;  %v383_v52 = vadd.f32 %v1130_v49, %v382_v50  ;;  %v384_v54 = vpop.f32.mrb[1].mxu0 }
 0x120   : > { %v463_v53 = vadd.f32 %v1130_v49, %v462_v51  ;;  %v464_v55 = vpop.f32.mrb[1].mxu1 }
 0x121   : > { %v541_v56 = vmax.f32 %v383_v52, 0.0 }
 0x122   : > { %v557_v57 = vmax.f32 %v463_v53, 0.0  ;;  %v387_v58 = vpop.f32.mrb[2].mxu0 }
 0x123   : > { %v467_v59 = vpop.f32.mrb[2].mxu1  ;;  %573 = vst [vmem:[%s1138_s22] sm:$0xff] %v541_v56  ;;  %v388_v60 = vadd.f32 %v1130_v49, %v387_v58  ;;  %v389_v62 = vpop.f32.mrb[3].mxu0 }
 0x124   : > { %589 = vst [vmem:[%s1138_s22 + $0x80] sm:$0xff] %v557_v57  ;;  %v468_v61 = vadd.f32 %v1130_v49, %v467_v59  ;;  %v469_v63 = vpop.f32.mrb[3].mxu1 }
 0x125   : > { %v542_v0 = vmax.f32 %v388_v60, 0.0 }
 0x126   : > { %v558_v1 = vmax.f32 %v468_v61, 0.0  ;;  %v392_v2 = vpop.f32.mrb[4].mxu0 }
 0x127   : > { %v472_v3 = vpop.f32.mrb[4].mxu1  ;;  %574 = vst [vmem:[%s1138_s22 + $0x8] sm:$0xff] %v542_v0  ;;  %v393_v4 = vadd.f32 %v1130_v49, %v392_v2  ;;  %v394_v6 = vpop.f32.mrb[5].mxu0 }
 0x128   : > { %590 = vst [vmem:[%s1138_s22 + $0x88] sm:$0xff] %v558_v1  ;;  %v473_v5 = vadd.f32 %v1130_v49, %v472_v3  ;;  %v474_v7 = vpop.f32.mrb[5].mxu1 }
 0x129   : > { %v543_v8 = vmax.f32 %v393_v4, 0.0 }
 0x12a   : > { %v559_v9 = vmax.f32 %v473_v5, 0.0  ;;  %v397_v10 = vpop.f32.mrb[6].mxu0 }
 0x12b   : > { %v477_v11 = vpop.f32.mrb[6].mxu1  ;;  %575 = vst [vmem:[%s1138_s22 + $0x10] sm:$0xff] %v543_v8  ;;  %v398_v12 = vadd.f32 %v1130_v49, %v397_v10  ;;  %v399_v14 = vpop.f32.mrb[7].mxu0 }
 0x12c   : > { %591 = vst [vmem:[%s1138_s22 + $0x90] sm:$0xff] %v559_v9  ;;  %v478_v13 = vadd.f32 %v1130_v49, %v477_v11  ;;  %v479_v15 = vpop.f32.mrb[7].mxu1 }
 0x12d   : > { %v544_v16 = vmax.f32 %v398_v12, 0.0 }
 0x12e   : > { %v560_v17 = vmax.f32 %v478_v13, 0.0  ;;  %v402_v18 = vpop.f32.mrb[8].mxu0 }
 0x12f   : > { %v482_v19 = vpop.f32.mrb[8].mxu1  ;;  %576 = vst [vmem:[%s1138_s22 + $0x18] sm:$0xff] %v544_v16  ;;  %v403_v20 = vadd.f32 %v1130_v49, %v402_v18  ;;  %v404_v22 = vpop.f32.mrb[9].mxu0 }
 0x130   : > { %592 = vst [vmem:[%s1138_s22 + $0x98] sm:$0xff] %v560_v17  ;;  %v483_v21 = vadd.f32 %v1130_v49, %v482_v19  ;;  %v484_v23 = vpop.f32.mrb[9].mxu1 }
 0x131   : > { %v545_v24 = vmax.f32 %v403_v20, 0.0 }
 0x132   : > { %v561_v25 = vmax.f32 %v483_v21, 0.0  ;;  %v407_v26 = vpop.f32.mrb[10].mxu0 }
 0x133   : > { %v487_v27 = vpop.f32.mrb[10].mxu1  ;;  %577 = vst [vmem:[%s1138_s22 + $0x20] sm:$0xff] %v545_v24  ;;  %v408_v28 = vadd.f32 %v1130_v49, %v407_v26  ;;  %v409_v30 = vpop.f32.mrb[11].mxu0 }
 0x134   : > { %593 = vst [vmem:[%s1138_s22 + $0xa0] sm:$0xff] %v561_v25  ;;  %v488_v29 = vadd.f32 %v1130_v49, %v487_v27  ;;  %v489_v31 = vpop.f32.mrb[11].mxu1 }
 0x135   : > { %v546_v32 = vmax.f32 %v408_v28, 0.0 }
 0x136   : > { %v562_v33 = vmax.f32 %v488_v29, 0.0  ;;  %v412_v34 = vpop.f32.mrb[12].mxu0 }
 0x137   : > { %v492_v35 = vpop.f32.mrb[12].mxu1  ;;  %578 = vst [vmem:[%s1138_s22 + $0x28] sm:$0xff] %v546_v32  ;;  %v413_v36 = vadd.f32 %v1130_v49, %v412_v34  ;;  %v414_v38 = vpop.f32.mrb[13].mxu0 }
 0x138   : > { %594 = vst [vmem:[%s1138_s22 + $0xa8] sm:$0xff] %v562_v33  ;;  %v493_v37 = vadd.f32 %v1130_v49, %v492_v35  ;;  %v494_v39 = vpop.f32.mrb[13].mxu1 }
 0x139   : > { %v547_v40 = vmax.f32 %v413_v36, 0.0 }
 0x13a   : > { %v563_v41 = vmax.f32 %v493_v37, 0.0  ;;  %v417_v42 = vpop.f32.mrb[14].mxu0 }
 0x13b   : > { %v497_v43 = vpop.f32.mrb[14].mxu1  ;;  %579 = vst [vmem:[%s1138_s22 + $0x30] sm:$0xff] %v547_v40  ;;  %v418_v44 = vadd.f32 %v1130_v49, %v417_v42  ;;  %v419_v46 = vpop.f32.mrb[15].mxu0 }
 0x13c   : > { %595 = vst [vmem:[%s1138_s22 + $0xb0] sm:$0xff] %v563_v41  ;;  %v498_v45 = vadd.f32 %v1130_v49, %v497_v43  ;;  %v499_v47 = vpop.f32.mrb[15].mxu1 }
 0x13d   : > { %v548_v48 = vmax.f32 %v418_v44, 0.0 }
 0x13e   : > { %v564_v50 = vmax.f32 %v498_v45, 0.0  ;;  %v422_v51 = vpop.f32.mrb[16].mxu0 }
 0x13f   : > { %v502_v52 = vpop.f32.mrb[16].mxu1  ;;  %580 = vst [vmem:[%s1138_s22 + $0x38] sm:$0xff] %v548_v48  ;;  %v423_v53 = vadd.f32 %v1130_v49, %v422_v51  ;;  %v424_v55 = vpop.f32.mrb[17].mxu0 }
 0x140   : > { %596 = vst [vmem:[%s1138_s22 + $0xb8] sm:$0xff] %v564_v50  ;;  %v503_v54 = vadd.f32 %v1130_v49, %v502_v52  ;;  %v504_v56 = vpop.f32.mrb[17].mxu1 }
 0x141   : > { %v549_v57 = vmax.f32 %v423_v53, 0.0 }
 0x142   : > { %v565_v58 = vmax.f32 %v503_v54, 0.0  ;;  %v427_v59 = vpop.f32.mrb[18].mxu0 }
 0x143   : > { %v507_v60 = vpop.f32.mrb[18].mxu1  ;;  %581 = vst [vmem:[%s1138_s22 + $0x40] sm:$0xff] %v549_v57  ;;  %v428_v61 = vadd.f32 %v1130_v49, %v427_v59  ;;  %v429_v63 = vpop.f32.mrb[19].mxu0 }
 0x144   : > { %597 = vst [vmem:[%s1138_s22 + $0xc0] sm:$0xff] %v565_v58  ;;  %v508_v62 = vadd.f32 %v1130_v49, %v507_v60  ;;  %v509_v0 = vpop.f32.mrb[19].mxu1 }
 0x145   : > { %v550_v1 = vmax.f32 %v428_v61, 0.0 }
 0x146   : > { %v566_v2 = vmax.f32 %v508_v62, 0.0  ;;  %v432_v3 = vpop.f32.mrb[20].mxu0 }
 0x147   : > { %v512_v4 = vpop.f32.mrb[20].mxu1  ;;  %582 = vst [vmem:[%s1138_s22 + $0x48] sm:$0xff] %v550_v1  ;;  %v433_v5 = vadd.f32 %v1130_v49, %v432_v3  ;;  %v434_v7 = vpop.f32.mrb[21].mxu0 }
 0x148   : > { %598 = vst [vmem:[%s1138_s22 + $0xc8] sm:$0xff] %v566_v2  ;;  %v513_v6 = vadd.f32 %v1130_v49, %v512_v4  ;;  %v514_v8 = vpop.f32.mrb[21].mxu1 }
 0x149   : > { %v551_v9 = vmax.f32 %v433_v5, 0.0 }
 0x14a   : > { %v567_v10 = vmax.f32 %v513_v6, 0.0  ;;  %v437_v11 = vpop.f32.mrb[22].mxu0 }
 0x14b   : > { %v517_v12 = vpop.f32.mrb[22].mxu1  ;;  %583 = vst [vmem:[%s1138_s22 + $0x50] sm:$0xff] %v551_v9  ;;  %v438_v13 = vadd.f32 %v1130_v49, %v437_v11  ;;  %v439_v15 = vpop.f32.mrb[23].mxu0 }
 0x14c   : > { %599 = vst [vmem:[%s1138_s22 + $0xd0] sm:$0xff] %v567_v10  ;;  %v518_v14 = vadd.f32 %v1130_v49, %v517_v12  ;;  %v519_v16 = vpop.f32.mrb[23].mxu1 }
 0x14d   : > { %v552_v17 = vmax.f32 %v438_v13, 0.0 }
 0x14e   : > { %v568_v18 = vmax.f32 %v518_v14, 0.0  ;;  %v442_v19 = vpop.f32.mrb[24].mxu0 }
 0x14f   : > { %v522_v20 = vpop.f32.mrb[24].mxu1  ;;  %584 = vst [vmem:[%s1138_s22 + $0x58] sm:$0xff] %v552_v17  ;;  %v443_v21 = vadd.f32 %v1130_v49, %v442_v19  ;;  %v444_v23 = vpop.f32.mrb[25].mxu0 }
 0x150   : > { %600 = vst [vmem:[%s1138_s22 + $0xd8] sm:$0xff] %v568_v18  ;;  %v523_v22 = vadd.f32 %v1130_v49, %v522_v20  ;;  %v524_v24 = vpop.f32.mrb[25].mxu1 }
 0x151   : > { %v553_v25 = vmax.f32 %v443_v21, 0.0 }
 0x152   : > { %v569_v26 = vmax.f32 %v523_v22, 0.0  ;;  %v447_v27 = vpop.f32.mrb[26].mxu0 }
 0x153   : > { %v527_v28 = vpop.f32.mrb[26].mxu1  ;;  %585 = vst [vmem:[%s1138_s22 + $0x60] sm:$0xff] %v553_v25  ;;  %v448_v29 = vadd.f32 %v1130_v49, %v447_v27  ;;  %v449_v31 = vpop.f32.mrb[27].mxu0 }
 0x154   : > { %601 = vst [vmem:[%s1138_s22 + $0xe0] sm:$0xff] %v569_v26  ;;  %v528_v30 = vadd.f32 %v1130_v49, %v527_v28  ;;  %v529_v32 = vpop.f32.mrb[27].mxu1 }
 0x155   : > { %v554_v33 = vmax.f32 %v448_v29, 0.0 }
 0x156   : > { %v570_v34 = vmax.f32 %v528_v30, 0.0  ;;  %v452_v35 = vpop.f32.mrb[28].mxu0 }
 0x157   : > { %v532_v36 = vpop.f32.mrb[28].mxu1  ;;  %586 = vst [vmem:[%s1138_s22 + $0x68] sm:$0xff] %v554_v33  ;;  %v453_v37 = vadd.f32 %v1130_v49, %v452_v35  ;;  %v454_v39 = vpop.f32.mrb[29].mxu0 }
 0x158   : > { %602 = vst [vmem:[%s1138_s22 + $0xe8] sm:$0xff] %v570_v34  ;;  %v533_v38 = vadd.f32 %v1130_v49, %v532_v36  ;;  %v534_v40 = vpop.f32.mrb[29].mxu1 }
 0x159   : > { %v555_v41 = vmax.f32 %v453_v37, 0.0 }
 0x15a   : > { %v571_v42 = vmax.f32 %v533_v38, 0.0  ;;  %v457_v43 = vpop.f32.mrb[30].mxu0 }
 0x15b   : > { %v537_v44 = vpop.f32.mrb[30].mxu1  ;;  %587 = vst [vmem:[%s1138_s22 + $0x70] sm:$0xff] %v555_v41  ;;  %v458_v45 = vadd.f32 %v1130_v49, %v457_v43  ;;  %v459_v47 = vpop.f32.mrb[31].mxu0 }
 0x15c   : > { %603 = vst [vmem:[%s1138_s22 + $0xf0] sm:$0xff] %v571_v42  ;;  %v538_v46 = vadd.f32 %v1130_v49, %v537_v44  ;;  %v539_v48 = vpop.f32.mrb[31].mxu1 }
 0x15d   : > { %v556_v50 = vmax.f32 %v458_v45, 0.0 }
 0x15e   : > { %v572_v51 = vmax.f32 %v538_v46, 0.0 }
 0x15f   : > { %588 = vst [vmem:[%s1138_s22 + $0x78] sm:$0xff] %v556_v50 }
 0x160   : > { %604 = vst [vmem:[%s1138_s22 + $0xf8] sm:$0xff] %v572_v51 }
 0x161 PF: > { %s13_s16 = sadd.s32 1, %s872_s16   ;;  %s1221_s12 = smov %s864_s14 }
 0x162   : > { %p10_p7 = scmp.ge.s32.totalorder %s13_s16, 6   ;;  %s1222_s13 = smov %s868_s15 }
 0x163   : > { %s1223_s14 = smov %s1226_s17  ;;  %s1224_s15 = smov %s1230_s18 }
 0x164   :  { %12 = sbr.rel (!%p10_p7) target bundleno = 3 (0x3), region = 62 }

</bundles_post_ra>
